<compile_context>
chip_gen: v7x
topology: tpu7x:2x2x1
jax: 0.10.0
libtpu: 0.0.40
codegen_flags: <defaults>
</compile_context>

<pallas_src>
import jax
import jax.numpy as jnp
from jax.experimental import pallas as pl
from jax.experimental.pallas import tpu as pltpu


def _lconv_folded_kernel(x_ref, t_ref, r_ref, o_ref):
    """y2 tile = x2 tile @ T tile + residual tile (one MXU matmul, f32 acc).

    x_ref: (tb, P)   x reshaped to (b, cin*d), zero-padded -- full contraction dim
    t_ref: (P, tn)   folded parameter T, N tile
    r_ref: (tb, tn)  residual slab (same padded x2, sliced along N)
    o_ref: (tb, tn)  output slab (lane-dense, written exactly once)
    """
    acc = jnp.dot(x_ref[...], t_ref[...], preferred_element_type=jnp.float32)
    acc = acc + r_ref[...].astype(jnp.float32)
    o_ref[...] = acc.astype(o_ref.dtype)


def _round_up(v, m):
    return ((v + m - 1) // m) * m


def _largest_aligned_divisor(p, cap):
    """Largest multiple of 128 that divides p (p % 128 == 0) and is <= cap."""
    if p <= cap:
        return p
    m = p // 128
    best = 1
    for k in range(1, m + 1):
        if m % k == 0 and 128 * k <= cap:
            best = k
    return 128 * best


def lconv_core(L, Wi, x, *, vmem_budget_bytes=32 * 1024 * 1024):
    """Pallas wrapper. L:(num_L,d,d), Wi:(num_L,cout,cin), x:(b,cin,d)."""
    num_L, d, d2 = L.shape
    assert d == d2
    num_L_w, cout, cin = Wi.shape
    assert num_L_w == num_L
    b = x.shape[0]
    assert x.shape == (b, cin, d)
    assert cout == cin, "residual connection requires cout == cin"

    dtype = x.dtype
    itemsize = jnp.dtype(dtype).itemsize

    # ---- fold Wi into L (parameter-sized einsum, done once in f32) ----
    # T[c*d + f, o*d + dd] = sum_k Wi[k, o, c] * L[k, dd, f]
    T = jnp.einsum('koc,kdf->cfod', Wi.astype(jnp.float32), L.astype(jnp.float32))
    T = T.reshape(cin * d, cout * d).astype(dtype)

    # ---- lane-dense padding: contraction and output dims -> multiple of 128 ----
    p0 = cin * d                     # == cout * d since cout == cin
    P = _round_up(p0, 128)

    # ---- N tile (must divide P); cap it so the T block fits the budget ----
    tn_cap = max(128, min(1024,
                          ((vmem_budget_bytes // 2) // max(1, 2 * P * itemsize)) // 128 * 128))
    tn = _largest_aligned_divisor(P, tn_cap)
    num_n = P // tn

    # ---- batch tile from a VMEM budget (f32 acc + resident T block included) ----
    def _vmem_need(tb_):
        return (2 * tb_ * P * itemsize      # x operand block (double-buffered)
                + 2 * tb_ * tn * itemsize   # residual block
                + 2 * tb_ * tn * itemsize   # output block
                + 2 * P * tn * itemsize     # folded T block
                + tb_ * tn * 4)             # f32 accumulator

    tb = 256                                # feed the MXU M dim / amortize grid overhead
    while tb > 8 and _vmem_need(tb) > vmem_budget_bytes:
        tb //= 2
    tb = min(tb, _round_up(b, 8))           # don't over-pad tiny batches
    if num_n == 1 and b > 8:                # v7x: prefer >= 2 grid points when possible
        tb = min(tb, _round_up((b + 1) // 2, 8))
    tb = max(8, tb)

    b_pad = _round_up(b, tb)
    num_b = b_pad // tb

    # ---- pad activations once in the wrapper (no divisor search / tb=1 cliff) ----
    x2 = jnp.pad(x.reshape(b, p0), ((0, b_pad - b), (0, P - p0)))
    Tp = jnp.pad(T, ((0, P - p0), (0, P - p0)))

    flops = 2 * b_pad * P * P + b_pad * P
    bytes_accessed = (2 * x2.size + Tp.size + b_pad * P) * itemsize

    y2 = pl.pallas_call(
        _lconv_folded_kernel,
        out_shape=jax.ShapeDtypeStruct((b_pad, P), dtype),
        grid_spec=pltpu.PrefetchScalarGridSpec(
            num_scalar_prefetch=0,
            grid=(num_n, num_b),             # inner axis = batch tiles: T block reused
            in_specs=[
                pl.BlockSpec((tb, P), lambda j, i: (i, 0)),    # x2: full contraction dim
                pl.BlockSpec((P, tn), lambda j, i: (0, j)),    # folded T, N tile
                pl.BlockSpec((tb, tn), lambda j, i: (i, j)),   # residual slab (same x2)
            ],
            out_specs=pl.BlockSpec((tb, tn), lambda j, i: (i, j)),
        ),
        compiler_params=pltpu.CompilerParams(
            dimension_semantics=("parallel", "parallel"),      # megacore-shardable
            vmem_limit_bytes=40 * 1024 * 1024,                 # < v7x 64 MiB/TC, headroom left
        ),
        cost_estimate=pl.CostEstimate(
            flops=flops, transcendentals=0, bytes_accessed=bytes_accessed),
    )(x2, Tp, x2)

    return y2[:b, :cout * d].reshape(b, cout, d)


def _kaiming_normal(key, shape):
    """Deterministic stand-in for nn.init.kaiming_normal_ (fan_in, relu gain)."""
    fan_in = 1
    for s in shape[1:]:
        fan_in *= s
    std = (2.0 / fan_in) ** 0.5
    return std * jax.random.normal(key, shape, dtype=jnp.float32)


if __name__ == "__main__":
    # Small shapes consistent with the module: d features, cin==cout channels.
    b, num_L, d, cin, cout = 2, 3, 16, 4, 4

    key = jax.random.PRNGKey(0)
    kL, kW, kx = jax.random.split(key, 3)

    L = _kaiming_normal(kL, (num_L, d, d))
    Wi = _kaiming_normal(kW, (num_L, cout, cin))
    x = jax.random.normal(kx, (b, cin, d), dtype=jnp.float32)

    y = lconv_core(L, Wi, x)
    y = jax.block_until_ready(y)

    # Pure-JAX reference for correctness.
    y_ref = jnp.einsum('kdf,bcf,koc->bod', L, x, Wi) + x
    assert y.shape == (b, cout, d)
    assert jnp.allclose(y, y_ref, atol=1e-4, rtol=1e-4), "mismatch vs reference"

    print("KERNEL_OK")
</pallas_src>

<mosaic_0001>
module attributes {stable_mosaic.version = 11 : i64} {
  func.func @_lconv_folded_kernel(%arg0: i32, %arg1: i32, %arg2: memref<8x128xf32, #tpu.memory_space<vmem>>, %arg3: memref<128x128xf32, #tpu.memory_space<vmem>>, %arg4: memref<8x128xf32, #tpu.memory_space<vmem>>, %arg5: memref<8x128xf32, #tpu.memory_space<vmem>>) attributes {dimension_semantics = [#tpu.dimension_semantics<parallel>, #tpu.dimension_semantics<parallel>], iteration_bounds = array<i64: 1, 1>, scalar_prefetch = 0 : i64, scratch_operands = 0 : i64, tpu.core_type = #tpu.core_type<tc>, window_params = [{transform_indices = @transform_0, window_bounds = array<i64: 8, 128>}, {transform_indices = @transform_1, window_bounds = array<i64: 128, 128>}, {transform_indices = @transform_2, window_bounds = array<i64: 8, 128>}, {transform_indices = @transform_3, window_bounds = array<i64: 8, 128>}]} {
    %c0 = arith.constant 0 : index
    %c0_0 = arith.constant 0 : index
    %0 = vector.load %arg2[%c0, %c0_0] : memref<8x128xf32, #tpu.memory_space<vmem>>, vector<8x128xf32>
    %c0_1 = arith.constant 0 : index
    %c0_2 = arith.constant 0 : index
    %1 = vector.load %arg3[%c0_1, %c0_2] : memref<128x128xf32, #tpu.memory_space<vmem>>, vector<128x128xf32>
    %cst = arith.constant dense<0.000000e+00> : vector<8x128xf32>
    %2 = tpu.matmul %0, %1, %cst {dimension_numbers = #tpu.dot_dimension_numbers<[1], [0], [0], [1], [0, 0, 1, 1], [], []>} : vector<8x128xf32>, vector<128x128xf32>, vector<8x128xf32> -> vector<8x128xf32>
    %c0_3 = arith.constant 0 : index
    %c0_4 = arith.constant 0 : index
    %3 = vector.load %arg4[%c0_3, %c0_4] : memref<8x128xf32, #tpu.memory_space<vmem>>, vector<8x128xf32>
    %4 = arith.addf %2, %3 : vector<8x128xf32>
    %c0_5 = arith.constant 0 : index
    %c0_6 = arith.constant 0 : index
    %5 = vector.load %arg5[%c0_5, %c0_6] : memref<8x128xf32, #tpu.memory_space<vmem>>, vector<8x128xf32>
    tpu.vector_store %arg5[%c0_5, %c0_6], %4 {strides = array<i32>} : memref<8x128xf32, #tpu.memory_space<vmem>>, vector<8x128xf32>,
    return
  }
  func.func @transform_0(%arg0: i32, %arg1: i32) -> (i32, i32) {
    %c0_i32 = arith.constant 0 : i32
    %c0_i32_0 = arith.constant 0 : i32
    return %arg1, %c0_i32 : i32, i32
  }
  func.func @transform_1(%arg0: i32, %arg1: i32) -> (i32, i32) {
    %c0_i32 = arith.constant 0 : i32
    %c0_i32_0 = arith.constant 0 : i32
    return %c0_i32, %arg0 : i32, i32
  }
  func.func @transform_2(%arg0: i32, %arg1: i32) -> (i32, i32) {
    %c0_i32 = arith.constant 0 : i32
    return %arg1, %arg0 : i32, i32
  }
  func.func @transform_3(%arg0: i32, %arg1: i32) -> (i32, i32) {
    %c0_i32 = arith.constant 0 : i32
    return %arg1, %arg0 : i32, i32
  }
}

</mosaic_0001>

<bundles_post_ra>
// kernel: tpu_custom_call.1
= control target key start
LH: loop header
LB: loop body
LE: loop exit
PB: predicated region body
PF: predicated region fallthrough
CT: control target
= control target key end

     0   :  { %8 = vsyncpa [#allocation3], 0  ;;  %s413_s0 = inlined_call_operand.hbm [shape: f32[8,128], index: 0, kind: input, shape index: {}]   ;;  %s414_s1 = inlined_call_operand.hbm [shape: f32[128,128], index: 1, kind: input, shape index: {}]   ;;  %s415_s2 = inlined_call_operand.hbm [shape: f32[8,128], index: 2, kind: input, shape index: {}]   ;;  %s416_s3 = inlined_call_operand.hbm [shape: f32[8,128], index: 3, kind: output, shape index: {}]  }
   0x1   :  { %9 = vsyncpa [#allocation6], 0 }
   0x2   :  { %10 = vsyncpa [#allocation4], 0  ;;  %s336_s12 = smov [#allocation5]   ;;  %s242_s16 = scalar_lea.hbm %s414_s1, 2048 }
   0x3   :  { %s26_s13 = sshll.u32 %s336_s12, 4  ;;  %p243_p0 = scmp.ne.s32.totalorder %s414_s1, %s242_s16  ;;  %s27_s13 = int_to_ptr.vmem [resolvable:$true] %s26_s13 }
   0x4   :  { %p246_p1 = scmp.lt.u32.totalorder %s242_s16, %s414_s1 }
   0x6   :  { %p248_p2 = pnand %p246_p1, %p243_p0 }
   0x8   :  { %251 = shalt.err (!%p248_p2)
}
   0x9   :  { %s252_s21 = scalar_lea.vmem %s27_s13, 2048  ;;  %p257_p4 = scmp.lt.s32.totalorder %s27_s13, %s27_s13 }
   0xa   :  { %p253_p3 = scmp.ne.s32.totalorder %s27_s13, %s252_s21  ;;  %p258_p5 = scmp.lt.s32.totalorder %s252_s21, %s252_s21 }
   0xc   :  { %p259_p6 = por %p258_p5, %p257_p4 }
   0xe   :  { %p260_p7 = pnand %p259_p6, %p253_p3 }
  0x10   :  { %263 = shalt.err (!%p260_p7)
}
  0x11   :  { %s337_s22 = smov 128   ;;  %s338_s23 = smov 8  }
  0x12   :  { %32 = dma.hbm_to_vmem [thread:$0]  %s414_s1, 2048, %s27_s13, [#allocation6], %s337_s22, %s337_s22, %s338_s23  }
  0x13   :  { %s339_s26 = smov [#allocation2]   ;;  %s340_s28 = smov [#allocation7]  }
  0x14   :  { %s17_s27 = sshll.u32 %s339_s26, 4  ;;  %s39_s29 = sshll.u32 %s340_s28, 4  ;;  %s18_s27 = int_to_ptr.vmem [resolvable:$true] %s17_s27  ;;  %s40_s29 = int_to_ptr.vmem [resolvable:$true] %s39_s29 }
  0x15   :  { %s264_s5 = scalar_lea.hbm %s413_s0, 128 }
  0x16   :  { %p265_p8 = scmp.ne.s32.totalorder %s413_s0, %s264_s5  ;;  %p268_p9 = scmp.lt.u32.totalorder %s264_s5, %s413_s0 }
  0x18   :  { %p270_p10 = pnand %p268_p9, %p265_p8 }
  0x1a   :  { %273 = shalt.err (!%p270_p10)
}
  0x1b   :  { %s274_s1 = scalar_lea.vmem %s18_s27, 128  ;;  %p279_p12 = scmp.lt.s32.totalorder %s18_s27, %s18_s27 }
  0x1c   :  { %p275_p11 = scmp.ne.s32.totalorder %s18_s27, %s274_s1  ;;  %p280_p13 = scmp.lt.s32.totalorder %s274_s1, %s274_s1 }
  0x1e   :  { %p281_p0 = por %p280_p13, %p279_p12 }
  0x20   :  { %p282_p1 = pnand %p281_p0, %p275_p11 }
  0x22   :  { %285 = shalt.err (!%p282_p1)
}
  0x23   :  { %20 = dma.hbm_to_vmem [thread:$0]  %s413_s0, 128, %s18_s27, [#allocation3]  }
  0x24   :  { %s286_s14 = scalar_lea.hbm %s415_s2, 128 }
  0x25   :  { %p287_p2 = scmp.ne.s32.totalorder %s415_s2, %s286_s14  ;;  %p290_p3 = scmp.lt.u32.totalorder %s286_s14, %s415_s2 }
  0x27   :  { %p292_p4 = pnand %p290_p3, %p287_p2 }
  0x29   :  { %295 = shalt.err (!%p292_p4)
}
  0x2a   :  { %s296_s19 = scalar_lea.vmem %s40_s29, 128  ;;  %p301_p6 = scmp.lt.s32.totalorder %s40_s29, %s40_s29 }
  0x2b   :  { %p297_p5 = scmp.ne.s32.totalorder %s40_s29, %s296_s19  ;;  %p302_p7 = scmp.lt.s32.totalorder %s296_s19, %s296_s19 }
  0x2d   :  { %p303_p8 = por %p302_p7, %p301_p6 }
  0x2f   :  { %p304_p9 = pnand %p303_p8, %p297_p5 }
  0x31   :  { %307 = shalt.err (!%p304_p9)
}
  0x32   :  { %42 = dma.hbm_to_vmem [thread:$0]  %s415_s2, 128, %s40_s29, [#allocation6]  }
  0x33   :  { %330 = dma.done.wait [#allocation3], 128  }
  0x34   :  { %331 = vsyncadd [#allocation3], 4294967168 }
  0x35   :  { %332 = dma.done.wait [#allocation6], 2176  }
  0x36   :  { %333 = vsyncadd [#allocation6], 4294965120  ;;  %v341_v0 = vmov 0.0|0.0   ;;  %vm342_vm0 = vmmov 0   ;;  %v343_v1 = vmov 0.0   ;;  %v53_v2 = vld [vmem:[#allocation5] sm:$0xff] }
  0x37   :  { %209 = vmatprep.subr.bf16.mxu0 %v341_v0  ;;  %206 = vmatprep.mubr.msk.f32.mxu0 %vm342_vm0, %v343_v1  ;;  %v54_v3 = vld [vmem:[#allocation5 + $0x8] sm:$0xff]  ;;  %v55_v4 = vld [vmem:[#allocation5 + $0x10] sm:$0xff]  ;;  %v56_v6 = vld [vmem:[#allocation5 + $0x18] sm:$0xff]  ;;  %s344_s2 = smov [#allocation8]  }
  0x38   :  { %v210_v5 = vpack.c.bf16 %v54_v3, %v53_v2  ;;  %v213_v7 = vpack.c.bf16 %v56_v6, %v55_v4  ;;  %v57_v8 = vld [vmem:[#allocation5 + $0x20] sm:$0xff]  ;;  %v58_v9 = vld [vmem:[#allocation5 + $0x28] sm:$0xff]  ;;  %v59_v11 = vld [vmem:[#allocation5 + $0x30] sm:$0xff]  ;;  %s147_s21 = sshll.u32 %s344_s2, 4  ;;  %s148_s21 = int_to_ptr.vmem [resolvable:$true] %s147_s21 }
  0x39   :  { %v216_v10 = vpack.c.bf16 %v58_v9, %v57_v8  ;;  %v60_v12 = vld [vmem:[#allocation5 + $0x38] sm:$0xff]  ;;  %v61_v14 = vld [vmem:[#allocation5 + $0x40] sm:$0xff]  ;;  %v62_v15 = vld [vmem:[#allocation5 + $0x48] sm:$0xff]  ;;  %s308_s22 = scalar_lea.vmem %s148_s21, 128  ;;  %p313_p11 = scmp.lt.s32.totalorder %s148_s21, %s148_s21 }
  0x3a   :  { %211 = vmatpush3.bf16.msra.mxu0 %v210_v5  ;;  %v219_v13 = vpack.c.bf16 %v60_v12, %v59_v11  ;;  %v222_v16 = vpack.c.bf16 %v62_v15, %v61_v14  ;;  %v63_v17 = vld [vmem:[#allocation5 + $0x50] sm:$0xff]  ;;  %v64_v18 = vld [vmem:[#allocation5 + $0x58] sm:$0xff]  ;;  %v65_v20 = vld [vmem:[#allocation5 + $0x60] sm:$0xff]  ;;  %p309_p10 = scmp.ne.s32.totalorder %s148_s21, %s308_s22  ;;  %p314_p12 = scmp.lt.s32.totalorder %s308_s22, %s308_s22 }
  0x3b   :  { %212 = vmatprep.subr.bf16.mxu0 %v341_v0  ;;  %v225_v19 = vpack.c.bf16 %v64_v18, %v63_v17  ;;  %v66_v21 = vld [vmem:[#allocation5 + $0x68] sm:$0xff]  ;;  %v67_v23 = vld [vmem:[#allocation5 + $0x70] sm:$0xff]  ;;  %v68_v24 = vld [vmem:[#allocation5 + $0x78] sm:$0xff] }
  0x3c   :  { %v228_v22 = vpack.c.bf16 %v66_v21, %v65_v20  ;;  %v231_v25 = vpack.c.bf16 %v68_v24, %v67_v23  ;;  %v52_v26 = vld [vmem:[#allocation2] sm:$0xff]  ;;  %v69_v27 = vld [vmem:[#allocation7] sm:$0xff]  ;;  %p315_p13 = por %p314_p12, %p313_p11 }
  0x3e   :  { %214 = vmatpush3.bf16.msra.mxu0 %v213_v7  ;;  %p316_p0 = pnand %p315_p13, %p309_p10 }
  0x3f   :  { %215 = vmatprep.subr.bf16.mxu0 %v341_v0 }
  0x42   :  { %217 = vmatpush3.bf16.msra.mxu0 %v216_v10 }
  0x43   :  { %218 = vmatprep.subr.bf16.mxu0 %v341_v0 }
  0x46   :  { %220 = vmatpush3.bf16.msra.mxu0 %v219_v13 }
  0x47   :  { %221 = vmatprep.subr.bf16.mxu0 %v341_v0 }
  0x4a   :  { %223 = vmatpush3.bf16.msra.mxu0 %v222_v16 }
  0x4b   :  { %224 = vmatprep.subr.bf16.mxu0 %v341_v0 }
  0x4e   :  { %226 = vmatpush3.bf16.msra.mxu0 %v225_v19 }
  0x4f   :  { %227 = vmatprep.subr.bf16.mxu0 %v341_v0 }
  0x52   :  { %229 = vmatpush3.bf16.msra.mxu0 %v228_v22 }
  0x53   :  { %230 = vmatprep.subr.bf16.mxu0 %v341_v0 }
  0x56   :  { %232 = vmatpush3.bf16.msra.mxu0 %v231_v25 }
  0x59   :  { %207 = vmatmul.mubr.f32.vlgmr.msra.gmra.mrb[0].mxu0 %v52_v26 }
 0x12c   :  { %v136_v28 = vpop.f32.mrb[0].mxu0 }
 0x12d   :  { %v137_v29 = vadd.f32 %v136_v28, %v69_v27  ;;  %v208_v30 = vpop.f32.mrb[1].mxu0 }
 0x12f   :  { %140 = vst [vmem:[#allocation8] sm:$0xff] %v137_v29 }
 0x130   :  { %319 = shalt.err (!%p316_p0)
}
 0x131   :  { %s320_s25 = scalar_lea.hbm %s416_s3, 128 }
 0x132   :  { %p321_p1 = scmp.ne.s32.totalorder %s416_s3, %s320_s25  ;;  %p324_p2 = scmp.lt.u32.totalorder %s320_s25, %s416_s3 }
 0x134   :  { %p326_p3 = pnand %p324_p2, %p321_p1 }
 0x136   :  { %329 = shalt.err (!%p326_p3)
}
 0x137   :  { %150 = dma.vmem_to_hbm [thread:$0]  %s148_s21, 128, %s416_s3, [#allocation4]  }
 0x138   :  { %334 = dma.done.wait [#allocation4], 128  }
 0x139   :  { %335 = vsyncadd [#allocation4], 4294967168 }
 0x13a   :  { %154 = vsyncpa [#allocation3], 1 }
 0x13b   :  { %155 = vsyncpa [#allocation6], 1 }
 0x13c   :  { %156 = vsyncpa [#allocation4], 1 }

</bundles_post_ra>
